<compile_context>
chip_gen: v6e
topology: v6e:2x2x1
jax: 0.10.0
libtpu: 0.0.40
codegen_flags: <defaults>
</compile_context>

<pallas_src>
import functools
import math

import numpy as np
import jax
import jax.numpy as jnp
from jax.experimental import pallas as pl
from jax.experimental.pallas import tpu as pltpu


# Items smaller than this never see a kernel: launch/dispatch overhead
# dominates the copy by 10-100x for pose-sized arrays.
_SMALL_BYTES = 64 * 1024
# Per-buffer block budget.  in+out, double-buffered => ~4x this in VMEM
# (~16 MiB), inside every generation's budget (incl. v7x 64 MiB per TC).
_TARGET_BLOCK_BYTES = 4 << 20
# Explicit scoped-VMEM limit so the default (16 MiB on v5e, 32 MiB on
# v6e/v7x) never becomes the ceiling for the 4 MiB blocks.
_VMEM_LIMIT_BYTES = 32 << 20


def _copy_kernel(x_ref, o_ref):
    # Pure pass-through copy: value/dtype preserving, no arithmetic.
    o_ref[...] = x_ref[...]


def _row_block_index(i):
    return (i, 0)


def _plan_tiling(n, itemsize):
    """Pick a padding-free lane-dense layout (cols, tile_rows, rows).

    Returns None if no 128-multiple column count divides n (caller falls
    back to a plain XLA copy -- avoids the pad + tail-slice HBM round trips
    the previous version paid).
    """
    sub = max(8, 32 // max(1, itemsize))          # sublane multiple for dtype
    for cols in (1024, 512, 256, 128):
        if n % cols == 0 and n // cols > 0:
            rows = n // cols
            max_tm = max(sub, (_TARGET_BLOCK_BYTES // (cols * itemsize)) // sub * sub)
            if rows <= max_tm:
                # Single block covering the full row extent: always legal
                # (block dim == full array dim), grid of 1.
                tm = rows
            else:
                # Fixed large tile; last block may be ragged -- Pallas masks
                # the out-of-bounds reads/writes, no divisor-search cliff.
                tm = max_tm
            return cols, tm, rows
    return None


@functools.lru_cache(maxsize=None)
def _build_copy_fn(shape, dtype_name):
    """Compile (once per shape/dtype) the lane-dense, tiled materialized copy.

    Returns None if no padding-free layout exists for this shape/dtype.
    """
    dtype = jnp.dtype(dtype_name)
    n = math.prod(shape)
    plan = _plan_tiling(n, dtype.itemsize)
    if plan is None:
        return None
    cols, tm, rows = plan
    grid = (pl.cdiv(rows, tm),)

    copy = pl.pallas_call(
        _copy_kernel,
        out_shape=jax.ShapeDtypeStruct((rows, cols), dtype),
        grid=grid,
        in_specs=[pl.BlockSpec((tm, cols), _row_block_index)],
        out_specs=pl.BlockSpec((tm, cols), _row_block_index),
        compiler_params=pltpu.CompilerParams(
            # 1-D grid sharded across TCs on v7x; no-op on v5e/v6e.
            # TODO(synk): confirm in xprof that both v7x TCs issue DMAs; if
            # not, add an explicit leading core axis of size 2.
            dimension_semantics=("parallel",),
            vmem_limit_bytes=_VMEM_LIMIT_BYTES,
        ),
        cost_estimate=pl.CostEstimate(
            flops=0,
            transcendentals=0,
            bytes_accessed=2 * rows * cols * dtype.itemsize,
        ),
    )

    def fn(x):
        # n divisible by cols => (rows, cols) reshape is a free row-major
        # relayout: no pad, no tail slice, one HBM read + one HBM write total.
        return copy(x.reshape(rows, cols)).reshape(shape)

    # jit so the reshapes fuse with the pallas_call into one executable per
    # (shape, dtype), cached by lru_cache above.
    return jax.jit(fn)


def pose_to_tensor(x, copy=False):
    """JAX/Pallas equivalent of PoseToTensor.forward.

    Args:
        x: a sequence of array-like items (numpy arrays, jnp arrays, or
           Python scalars), as produced by the pose pipeline.
        copy: if False (default, matches to_tensor's zero-copy
           torch.from_numpy semantics) items are returned as device arrays
           with no kernel and no extra HBM traffic.  If True, large items
           are materialized into fresh buffers via the Pallas tiled copy.

    Returns:
        list of jnp.ndarray, one per input item (values/dtypes preserved).
    """
    # TODO(synk): mmcv's to_tensor also accepts dict/str leaves; only
    # array-like / scalar items are handled here (host-side glue, not kernel).
    data = []
    for item in x:
        arr = jnp.asarray(item)        # no-op for arrays already on device
        if not copy:
            # Identity transform: no kernel, no traffic.
            data.append(arr)
            continue
        nbytes = arr.size * arr.dtype.itemsize
        if arr.ndim == 0 or nbytes < _SMALL_BYTES:
            # Tiny item: a kernel launch would be 100% overhead.
            data.append(jnp.array(arr, copy=True))
            continue
        fn = _build_copy_fn(arr.shape, arr.dtype.name)
        if fn is None:
            # No padding-free lane-dense layout; plain XLA copy instead of
            # paying pad + slice HBM round trips.
            data.append(jnp.array(arr, copy=True))
        else:
            data.append(fn(arr))
    return data


if __name__ == "__main__":
    key = jax.random.PRNGKey(0)
    k0, k1, k2, k3, k4 = jax.random.split(key, 5)

    # Small shapes consistent with a pose pipeline sample:
    #   keypoints: (batch=2, channels=4, T=16, V=16)  -> small, direct path
    #   scores:    (2, 16, 16)                        -> small, direct path
    #   label:     (2,) int32                         -> small, direct path
    #   heatmaps:  (2, 17, 96, 96) f32 (~1.2 MiB)     -> single-block Pallas copy
    #   hm stack:  (8, 17, 96, 96) f32 (~4.8 MiB)     -> multi-block, ragged
    #                                                    last block (edge check)
    kp = jax.random.normal(k0, (2, 4, 16, 16), dtype=jnp.float32)
    score = jax.random.uniform(k1, (2, 16, 16), dtype=jnp.float32)
    label = jax.random.randint(k2, (2,), 0, 10, dtype=jnp.int32)
    heatmap = jax.random.uniform(k3, (2, 17, 96, 96), dtype=jnp.float32)
    heatmap_stack = jax.random.uniform(k4, (8, 17, 96, 96), dtype=jnp.float32)

    inputs = [kp, score, label, heatmap, heatmap_stack]

    # Default path: zero-cost identity (matches to_tensor semantics).
    outputs_id = pose_to_tensor(inputs)
    for o in outputs_id:
        jax.block_until_ready(o)

    # Materialized-copy path: exercises the Pallas kernel (incl. the ragged
    # last block on heatmap_stack).
    outputs_cp = pose_to_tensor(inputs, copy=True)
    for o in outputs_cp:
        jax.block_until_ready(o)

    for inp, out_id, out_cp in zip(inputs, outputs_id, outputs_cp):
        for out in (out_id, out_cp):
            assert out.shape == inp.shape
            assert out.dtype == inp.dtype
            np.testing.assert_array_equal(np.asarray(out), np.asarray(inp))

    print("KERNEL_OK")
</pallas_src>

<mosaic_0001>
module attributes {stable_mosaic.version = 11 : i64} {
  func.func @_copy_kernel(%arg0: i32, %arg1: memref<306x1024xf32, #tpu.memory_space<vmem>>, %arg2: memref<306x1024xf32, #tpu.memory_space<vmem>>) attributes {dimension_semantics = [#tpu.dimension_semantics<parallel>], iteration_bounds = array<i64: 1>, scalar_prefetch = 0 : i64, scratch_operands = 0 : i64, tpu.core_type = #tpu.core_type<tc>, window_params = [{transform_indices = @transform_0, window_bounds = array<i64: 306, 1024>}, {transform_indices = @transform_1, window_bounds = array<i64: 306, 1024>}]} {
    %c0 = arith.constant 0 : index
    %c0_0 = arith.constant 0 : index
    %0 = vector.load %arg1[%c0, %c0_0] : memref<306x1024xf32, #tpu.memory_space<vmem>>, vector<306x1024xf32>
    %c0_1 = arith.constant 0 : index
    %c0_2 = arith.constant 0 : index
    %1 = vector.load %arg2[%c0_1, %c0_2] : memref<306x1024xf32, #tpu.memory_space<vmem>>, vector<306x1024xf32>
    tpu.vector_store %arg2[%c0_1, %c0_2], %0 {strides = array<i32>} : memref<306x1024xf32, #tpu.memory_space<vmem>>, vector<306x1024xf32>,
    return
  }
  func.func @transform_0(%arg0: i32) -> (i32, i32) {
    %c0_i32 = arith.constant 0 : i32
    %c0_i32_0 = arith.constant 0 : i32
    return %arg0, %c0_i32 : i32, i32
  }
  func.func @transform_1(%arg0: i32) -> (i32, i32) {
    %c0_i32 = arith.constant 0 : i32
    %c0_i32_0 = arith.constant 0 : i32
    return %arg0, %c0_i32 : i32, i32
  }
}

</mosaic_0001>

<bundles_post_ra>
// kernel: fn.1
= control target key start
LH: loop header
LB: loop body
LE: loop exit
PB: predicated region body
PF: predicated region fallthrough
CT: control target
= control target key end

     0   :  { %s2518_s0 = inlined_call_operand.vmem [shape: f32[306,1024], index: 0, kind: input, shape index: {}]   ;;  %s2519_s1 = inlined_call_operand.vmem [shape: f32[306,1024], index: 1, kind: output, shape index: {}]  }
   0x1   :  { %v8_v0 = vld [vmem:[%s2518_s0] sm:$0xff]  ;;  %v9_v1 = vld [vmem:[%s2518_s0 + $0x8] sm:$0xff]  ;;  %v10_v2 = vld [vmem:[%s2518_s0 + $0x10] sm:$0xff] }
   0x2   :  { %320 = vst [vmem:[%s2519_s1] sm:$0xff] %v8_v0  ;;  %321 = vst [vmem:[%s2519_s1 + $0x8] sm:$0xff] %v9_v1  ;;  %v11_v3 = vld [vmem:[%s2518_s0 + $0x18] sm:$0xff]  ;;  %v12_v4 = vld [vmem:[%s2518_s0 + $0x20] sm:$0xff] }
   0x3   :  { %322 = vst [vmem:[%s2519_s1 + $0x10] sm:$0xff] %v10_v2  ;;  %v13_v5 = vld [vmem:[%s2518_s0 + $0x28] sm:$0xff]  ;;  %323 = vst [vmem:[%s2519_s1 + $0x18] sm:$0xff] %v11_v3  ;;  %v14_v6 = vld [vmem:[%s2518_s0 + $0x30] sm:$0xff] }
   0x4   :  { %324 = vst [vmem:[%s2519_s1 + $0x20] sm:$0xff] %v12_v4  ;;  %325 = vst [vmem:[%s2519_s1 + $0x28] sm:$0xff] %v13_v5  ;;  %v15_v7 = vld [vmem:[%s2518_s0 + $0x38] sm:$0xff]  ;;  %v16_v8 = vld [vmem:[%s2518_s0 + $0x40] sm:$0xff] }
   0x5   :  { %326 = vst [vmem:[%s2519_s1 + $0x30] sm:$0xff] %v14_v6  ;;  %327 = vst [vmem:[%s2519_s1 + $0x38] sm:$0xff] %v15_v7  ;;  %v17_v9 = vld [vmem:[%s2518_s0 + $0x48] sm:$0xff]  ;;  %v18_v10 = vld [vmem:[%s2518_s0 + $0x50] sm:$0xff] }
   0x6   :  { %328 = vst [vmem:[%s2519_s1 + $0x40] sm:$0xff] %v16_v8  ;;  %v19_v11 = vld [vmem:[%s2518_s0 + $0x58] sm:$0xff]  ;;  %329 = vst [vmem:[%s2519_s1 + $0x48] sm:$0xff] %v17_v9  ;;  %v20_v12 = vld [vmem:[%s2518_s0 + $0x60] sm:$0xff] }
   0x7   :  { %330 = vst [vmem:[%s2519_s1 + $0x50] sm:$0xff] %v18_v10  ;;  %331 = vst [vmem:[%s2519_s1 + $0x58] sm:$0xff] %v19_v11  ;;  %v21_v13 = vld [vmem:[%s2518_s0 + $0x68] sm:$0xff]  ;;  %v22_v14 = vld [vmem:[%s2518_s0 + $0x70] sm:$0xff] }
   0x8   :  { %332 = vst [vmem:[%s2519_s1 + $0x60] sm:$0xff] %v20_v12  ;;  %333 = vst [vmem:[%s2519_s1 + $0x68] sm:$0xff] %v21_v13  ;;  %v23_v15 = vld [vmem:[%s2518_s0 + $0x78] sm:$0xff]  ;;  %v24_v16 = vld [vmem:[%s2518_s0 + $0x80] sm:$0xff] }
   0x9   :  { %334 = vst [vmem:[%s2519_s1 + $0x70] sm:$0xff] %v22_v14  ;;  %v25_v17 = vld [vmem:[%s2518_s0 + $0x88] sm:$0xff]  ;;  %335 = vst [vmem:[%s2519_s1 + $0x78] sm:$0xff] %v23_v15  ;;  %v26_v18 = vld [vmem:[%s2518_s0 + $0x90] sm:$0xff] }
   0xa   :  { %336 = vst [vmem:[%s2519_s1 + $0x80] sm:$0xff] %v24_v16  ;;  %337 = vst [vmem:[%s2519_s1 + $0x88] sm:$0xff] %v25_v17  ;;  %v27_v19 = vld [vmem:[%s2518_s0 + $0x98] sm:$0xff]  ;;  %v28_v20 = vld [vmem:[%s2518_s0 + $0xa0] sm:$0xff] }
   0xb   :  { %338 = vst [vmem:[%s2519_s1 + $0x90] sm:$0xff] %v26_v18  ;;  %339 = vst [vmem:[%s2519_s1 + $0x98] sm:$0xff] %v27_v19  ;;  %v29_v21 = vld [vmem:[%s2518_s0 + $0xa8] sm:$0xff]  ;;  %v30_v22 = vld [vmem:[%s2518_s0 + $0xb0] sm:$0xff] }
   0xc   :  { %340 = vst [vmem:[%s2519_s1 + $0xa0] sm:$0xff] %v28_v20  ;;  %v31_v23 = vld [vmem:[%s2518_s0 + $0xb8] sm:$0xff]  ;;  %341 = vst [vmem:[%s2519_s1 + $0xa8] sm:$0xff] %v29_v21  ;;  %v32_v24 = vld [vmem:[%s2518_s0 + $0xc0] sm:$0xff] }
   0xd   :  { %342 = vst [vmem:[%s2519_s1 + $0xb0] sm:$0xff] %v30_v22  ;;  %343 = vst [vmem:[%s2519_s1 + $0xb8] sm:$0xff] %v31_v23  ;;  %v33_v25 = vld [vmem:[%s2518_s0 + $0xc8] sm:$0xff]  ;;  %v34_v26 = vld [vmem:[%s2518_s0 + $0xd0] sm:$0xff] }
   0xe   :  { %344 = vst [vmem:[%s2519_s1 + $0xc0] sm:$0xff] %v32_v24  ;;  %345 = vst [vmem:[%s2519_s1 + $0xc8] sm:$0xff] %v33_v25  ;;  %v35_v27 = vld [vmem:[%s2518_s0 + $0xd8] sm:$0xff]  ;;  %v36_v28 = vld [vmem:[%s2518_s0 + $0xe0] sm:$0xff] }
   0xf   :  { %346 = vst [vmem:[%s2519_s1 + $0xd0] sm:$0xff] %v34_v26  ;;  %v37_v29 = vld [vmem:[%s2518_s0 + $0xe8] sm:$0xff]  ;;  %347 = vst [vmem:[%s2519_s1 + $0xd8] sm:$0xff] %v35_v27  ;;  %v38_v30 = vld [vmem:[%s2518_s0 + $0xf0] sm:$0xff] }
  0x10   :  { %348 = vst [vmem:[%s2519_s1 + $0xe0] sm:$0xff] %v36_v28  ;;  %349 = vst [vmem:[%s2519_s1 + $0xe8] sm:$0xff] %v37_v29  ;;  %v39_v31 = vld [vmem:[%s2518_s0 + $0xf8] sm:$0xff]  ;;  %v40_v32 = vld [vmem:[%s2518_s0 + $0x100] sm:$0xff] }
  0x11   :  { %350 = vst [vmem:[%s2519_s1 + $0xf0] sm:$0xff] %v38_v30  ;;  %351 = vst [vmem:[%s2519_s1 + $0xf8] sm:$0xff] %v39_v31  ;;  %v41_v33 = vld [vmem:[%s2518_s0 + $0x108] sm:$0xff]  ;;  %v42_v34 = vld [vmem:[%s2518_s0 + $0x110] sm:$0xff] }
  0x12   :  { %352 = vst [vmem:[%s2519_s1 + $0x100] sm:$0xff] %v40_v32  ;;  %v43_v35 = vld [vmem:[%s2518_s0 + $0x118] sm:$0xff]  ;;  %353 = vst [vmem:[%s2519_s1 + $0x108] sm:$0xff] %v41_v33  ;;  %v44_v36 = vld [vmem:[%s2518_s0 + $0x120] sm:$0xff] }
  0x13   :  { %354 = vst [vmem:[%s2519_s1 + $0x110] sm:$0xff] %v42_v34  ;;  %355 = vst [vmem:[%s2519_s1 + $0x118] sm:$0xff] %v43_v35  ;;  %v45_v37 = vld [vmem:[%s2518_s0 + $0x128] sm:$0xff]  ;;  %v46_v38 = vld [vmem:[%s2518_s0 + $0x130] sm:$0xff] }
  0x14   :  { %356 = vst [vmem:[%s2519_s1 + $0x120] sm:$0xff] %v44_v36  ;;  %357 = vst [vmem:[%s2519_s1 + $0x128] sm:$0xff] %v45_v37  ;;  %v47_v39 = vld [vmem:[%s2518_s0 + $0x138] sm:$0xff]  ;;  %v48_v40 = vld [vmem:[%s2518_s0 + $0x140] sm:$0xff] }
  0x15   :  { %358 = vst [vmem:[%s2519_s1 + $0x130] sm:$0xff] %v46_v38  ;;  %v49_v41 = vld [vmem:[%s2518_s0 + $0x148] sm:$0xff]  ;;  %359 = vst [vmem:[%s2519_s1 + $0x138] sm:$0xff] %v47_v39  ;;  %v50_v42 = vld [vmem:[%s2518_s0 + $0x150] sm:$0xff] }
  0x16   :  { %360 = vst [vmem:[%s2519_s1 + $0x140] sm:$0xff] %v48_v40  ;;  %361 = vst [vmem:[%s2519_s1 + $0x148] sm:$0xff] %v49_v41  ;;  %v51_v43 = vld [vmem:[%s2518_s0 + $0x158] sm:$0xff]  ;;  %v52_v44 = vld [vmem:[%s2518_s0 + $0x160] sm:$0xff] }
  0x17   :  { %362 = vst [vmem:[%s2519_s1 + $0x150] sm:$0xff] %v50_v42  ;;  %363 = vst [vmem:[%s2519_s1 + $0x158] sm:$0xff] %v51_v43  ;;  %v53_v45 = vld [vmem:[%s2518_s0 + $0x168] sm:$0xff]  ;;  %v54_v46 = vld [vmem:[%s2518_s0 + $0x170] sm:$0xff] }
  0x18   :  { %364 = vst [vmem:[%s2519_s1 + $0x160] sm:$0xff] %v52_v44  ;;  %v55_v47 = vld [vmem:[%s2518_s0 + $0x178] sm:$0xff]  ;;  %365 = vst [vmem:[%s2519_s1 + $0x168] sm:$0xff] %v53_v45  ;;  %v56_v48 = vld [vmem:[%s2518_s0 + $0x180] sm:$0xff] }
  0x19   :  { %366 = vst [vmem:[%s2519_s1 + $0x170] sm:$0xff] %v54_v46  ;;  %367 = vst [vmem:[%s2519_s1 + $0x178] sm:$0xff] %v55_v47  ;;  %v57_v49 = vld [vmem:[%s2518_s0 + $0x188] sm:$0xff]  ;;  %v58_v50 = vld [vmem:[%s2518_s0 + $0x190] sm:$0xff] }
  0x1a   :  { %368 = vst [vmem:[%s2519_s1 + $0x180] sm:$0xff] %v56_v48  ;;  %369 = vst [vmem:[%s2519_s1 + $0x188] sm:$0xff] %v57_v49  ;;  %v59_v51 = vld [vmem:[%s2518_s0 + $0x198] sm:$0xff]  ;;  %v60_v52 = vld [vmem:[%s2518_s0 + $0x1a0] sm:$0xff] }
  0x1b   :  { %370 = vst [vmem:[%s2519_s1 + $0x190] sm:$0xff] %v58_v50  ;;  %v61_v53 = vld [vmem:[%s2518_s0 + $0x1a8] sm:$0xff]  ;;  %371 = vst [vmem:[%s2519_s1 + $0x198] sm:$0xff] %v59_v51  ;;  %v62_v54 = vld [vmem:[%s2518_s0 + $0x1b0] sm:$0xff] }
  0x1c   :  { %372 = vst [vmem:[%s2519_s1 + $0x1a0] sm:$0xff] %v60_v52  ;;  %373 = vst [vmem:[%s2519_s1 + $0x1a8] sm:$0xff] %v61_v53  ;;  %v63_v55 = vld [vmem:[%s2518_s0 + $0x1b8] sm:$0xff]  ;;  %v64_v56 = vld [vmem:[%s2518_s0 + $0x1c0] sm:$0xff] }
  0x1d   :  { %374 = vst [vmem:[%s2519_s1 + $0x1b0] sm:$0xff] %v62_v54  ;;  %375 = vst [vmem:[%s2519_s1 + $0x1b8] sm:$0xff] %v63_v55  ;;  %v65_v57 = vld [vmem:[%s2518_s0 + $0x1c8] sm:$0xff]  ;;  %v66_v58 = vld [vmem:[%s2518_s0 + $0x1d0] sm:$0xff] }
  0x1e   :  { %376 = vst [vmem:[%s2519_s1 + $0x1c0] sm:$0xff] %v64_v56  ;;  %v67_v59 = vld [vmem:[%s2518_s0 + $0x1d8] sm:$0xff]  ;;  %377 = vst [vmem:[%s2519_s1 + $0x1c8] sm:$0xff] %v65_v57  ;;  %v68_v60 = vld [vmem:[%s2518_s0 + $0x1e0] sm:$0xff] }
  0x1f   :  { %378 = vst [vmem:[%s2519_s1 + $0x1d0] sm:$0xff] %v66_v58  ;;  %379 = vst [vmem:[%s2519_s1 + $0x1d8] sm:$0xff] %v67_v59  ;;  %v69_v61 = vld [vmem:[%s2518_s0 + $0x1e8] sm:$0xff]  ;;  %v70_v62 = vld [vmem:[%s2518_s0 + $0x1f0] sm:$0xff] }
  0x20   :  { %380 = vst [vmem:[%s2519_s1 + $0x1e0] sm:$0xff] %v68_v60  ;;  %381 = vst [vmem:[%s2519_s1 + $0x1e8] sm:$0xff] %v69_v61  ;;  %v71_v63 = vld [vmem:[%s2518_s0 + $0x1f8] sm:$0xff]  ;;  %v72_v0 = vld [vmem:[%s2518_s0 + $0x200] sm:$0xff] }
  0x21   :  { %382 = vst [vmem:[%s2519_s1 + $0x1f0] sm:$0xff] %v70_v62  ;;  %v73_v1 = vld [vmem:[%s2518_s0 + $0x208] sm:$0xff]  ;;  %383 = vst [vmem:[%s2519_s1 + $0x1f8] sm:$0xff] %v71_v63  ;;  %v74_v2 = vld [vmem:[%s2518_s0 + $0x210] sm:$0xff] }
  0x22   :  { %384 = vst [vmem:[%s2519_s1 + $0x200] sm:$0xff] %v72_v0  ;;  %385 = vst [vmem:[%s2519_s1 + $0x208] sm:$0xff] %v73_v1  ;;  %v75_v3 = vld [vmem:[%s2518_s0 + $0x218] sm:$0xff]  ;;  %v76_v4 = vld [vmem:[%s2518_s0 + $0x220] sm:$0xff] }
  0x23   :  { %386 = vst [vmem:[%s2519_s1 + $0x210] sm:$0xff] %v74_v2  ;;  %387 = vst [vmem:[%s2519_s1 + $0x218] sm:$0xff] %v75_v3  ;;  %v77_v5 = vld [vmem:[%s2518_s0 + $0x228] sm:$0xff]  ;;  %v78_v6 = vld [vmem:[%s2518_s0 + $0x230] sm:$0xff] }
  0x24   :  { %388 = vst [vmem:[%s2519_s1 + $0x220] sm:$0xff] %v76_v4  ;;  %v79_v7 = vld [vmem:[%s2518_s0 + $0x238] sm:$0xff]  ;;  %389 = vst [vmem:[%s2519_s1 + $0x228] sm:$0xff] %v77_v5  ;;  %v80_v8 = vld [vmem:[%s2518_s0 + $0x240] sm:$0xff] }
  0x25   :  { %390 = vst [vmem:[%s2519_s1 + $0x230] sm:$0xff] %v78_v6  ;;  %391 = vst [vmem:[%s2519_s1 + $0x238] sm:$0xff] %v79_v7  ;;  %v81_v9 = vld [vmem:[%s2518_s0 + $0x248] sm:$0xff]  ;;  %v82_v10 = vld [vmem:[%s2518_s0 + $0x250] sm:$0xff] }
  0x26   :  { %392 = vst [vmem:[%s2519_s1 + $0x240] sm:$0xff] %v80_v8  ;;  %393 = vst [vmem:[%s2519_s1 + $0x248] sm:$0xff] %v81_v9  ;;  %v83_v11 = vld [vmem:[%s2518_s0 + $0x258] sm:$0xff]  ;;  %v84_v12 = vld [vmem:[%s2518_s0 + $0x260] sm:$0xff] }
  0x27   :  { %394 = vst [vmem:[%s2519_s1 + $0x250] sm:$0xff] %v82_v10  ;;  %v85_v13 = vld [vmem:[%s2518_s0 + $0x268] sm:$0xff]  ;;  %395 = vst [vmem:[%s2519_s1 + $0x258] sm:$0xff] %v83_v11  ;;  %v86_v14 = vld [vmem:[%s2518_s0 + $0x270] sm:$0xff] }
  0x28   :  { %396 = vst [vmem:[%s2519_s1 + $0x260] sm:$0xff] %v84_v12  ;;  %397 = vst [vmem:[%s2519_s1 + $0x268] sm:$0xff] %v85_v13  ;;  %v87_v15 = vld [vmem:[%s2518_s0 + $0x278] sm:$0xff]  ;;  %v88_v16 = vld [vmem:[%s2518_s0 + $0x280] sm:$0xff] }
  0x29   :  { %398 = vst [vmem:[%s2519_s1 + $0x270] sm:$0xff] %v86_v14  ;;  %399 = vst [vmem:[%s2519_s1 + $0x278] sm:$0xff] %v87_v15  ;;  %v89_v17 = vld [vmem:[%s2518_s0 + $0x288] sm:$0xff]  ;;  %v90_v18 = vld [vmem:[%s2518_s0 + $0x290] sm:$0xff] }
  0x2a   :  { %400 = vst [vmem:[%s2519_s1 + $0x280] sm:$0xff] %v88_v16  ;;  %v91_v19 = vld [vmem:[%s2518_s0 + $0x298] sm:$0xff]  ;;  %401 = vst [vmem:[%s2519_s1 + $0x288] sm:$0xff] %v89_v17  ;;  %v92_v20 = vld [vmem:[%s2518_s0 + $0x2a0] sm:$0xff] }
  0x2b   :  { %402 = vst [vmem:[%s2519_s1 + $0x290] sm:$0xff] %v90_v18  ;;  %403 = vst [vmem:[%s2519_s1 + $0x298] sm:$0xff] %v91_v19  ;;  %v93_v21 = vld [vmem:[%s2518_s0 + $0x2a8] sm:$0xff]  ;;  %v94_v22 = vld [vmem:[%s2518_s0 + $0x2b0] sm:$0xff] }
  0x2c   :  { %404 = vst [vmem:[%s2519_s1 + $0x2a0] sm:$0xff] %v92_v20  ;;  %405 = vst [vmem:[%s2519_s1 + $0x2a8] sm:$0xff] %v93_v21  ;;  %v95_v23 = vld [vmem:[%s2518_s0 + $0x2b8] sm:$0xff]  ;;  %v96_v24 = vld [vmem:[%s2518_s0 + $0x2c0] sm:$0xff] }
  0x2d   :  { %406 = vst [vmem:[%s2519_s1 + $0x2b0] sm:$0xff] %v94_v22  ;;  %v97_v25 = vld [vmem:[%s2518_s0 + $0x2c8] sm:$0xff]  ;;  %407 = vst [vmem:[%s2519_s1 + $0x2b8] sm:$0xff] %v95_v23  ;;  %v98_v26 = vld [vmem:[%s2518_s0 + $0x2d0] sm:$0xff] }
  0x2e   :  { %408 = vst [vmem:[%s2519_s1 + $0x2c0] sm:$0xff] %v96_v24  ;;  %409 = vst [vmem:[%s2519_s1 + $0x2c8] sm:$0xff] %v97_v25  ;;  %v99_v27 = vld [vmem:[%s2518_s0 + $0x2d8] sm:$0xff]  ;;  %v100_v28 = vld [vmem:[%s2518_s0 + $0x2e0] sm:$0xff] }
  0x2f   :  { %410 = vst [vmem:[%s2519_s1 + $0x2d0] sm:$0xff] %v98_v26  ;;  %411 = vst [vmem:[%s2519_s1 + $0x2d8] sm:$0xff] %v99_v27  ;;  %v101_v29 = vld [vmem:[%s2518_s0 + $0x2e8] sm:$0xff]  ;;  %v102_v30 = vld [vmem:[%s2518_s0 + $0x2f0] sm:$0xff] }
  0x30   :  { %412 = vst [vmem:[%s2519_s1 + $0x2e0] sm:$0xff] %v100_v28  ;;  %v103_v31 = vld [vmem:[%s2518_s0 + $0x2f8] sm:$0xff]  ;;  %413 = vst [vmem:[%s2519_s1 + $0x2e8] sm:$0xff] %v101_v29  ;;  %v104_v32 = vld [vmem:[%s2518_s0 + $0x300] sm:$0xff] }
  0x31   :  { %414 = vst [vmem:[%s2519_s1 + $0x2f0] sm:$0xff] %v102_v30  ;;  %415 = vst [vmem:[%s2519_s1 + $0x2f8] sm:$0xff] %v103_v31  ;;  %v105_v33 = vld [vmem:[%s2518_s0 + $0x308] sm:$0xff]  ;;  %v106_v34 = vld [vmem:[%s2518_s0 + $0x310] sm:$0xff] }
  0x32   :  { %416 = vst [vmem:[%s2519_s1 + $0x300] sm:$0xff] %v104_v32  ;;  %417 = vst [vmem:[%s2519_s1 + $0x308] sm:$0xff] %v105_v33  ;;  %v107_v35 = vld [vmem:[%s2518_s0 + $0x318] sm:$0xff]  ;;  %v108_v36 = vld [vmem:[%s2518_s0 + $0x320] sm:$0xff] }
  0x33   :  { %418 = vst [vmem:[%s2519_s1 + $0x310] sm:$0xff] %v106_v34  ;;  %v109_v37 = vld [vmem:[%s2518_s0 + $0x328] sm:$0xff]  ;;  %419 = vst [vmem:[%s2519_s1 + $0x318] sm:$0xff] %v107_v35  ;;  %v110_v38 = vld [vmem:[%s2518_s0 + $0x330] sm:$0xff] }
  0x34   :  { %420 = vst [vmem:[%s2519_s1 + $0x320] sm:$0xff] %v108_v36  ;;  %421 = vst [vmem:[%s2519_s1 + $0x328] sm:$0xff] %v109_v37  ;;  %v111_v39 = vld [vmem:[%s2518_s0 + $0x338] sm:$0xff]  ;;  %v112_v40 = vld [vmem:[%s2518_s0 + $0x340] sm:$0xff] }
  0x35   :  { %422 = vst [vmem:[%s2519_s1 + $0x330] sm:$0xff] %v110_v38  ;;  %423 = vst [vmem:[%s2519_s1 + $0x338] sm:$0xff] %v111_v39  ;;  %v113_v41 = vld [vmem:[%s2518_s0 + $0x348] sm:$0xff]  ;;  %v114_v42 = vld [vmem:[%s2518_s0 + $0x350] sm:$0xff] }
  0x36   :  { %424 = vst [vmem:[%s2519_s1 + $0x340] sm:$0xff] %v112_v40  ;;  %v115_v43 = vld [vmem:[%s2518_s0 + $0x358] sm:$0xff]  ;;  %425 = vst [vmem:[%s2519_s1 + $0x348] sm:$0xff] %v113_v41  ;;  %v116_v44 = vld [vmem:[%s2518_s0 + $0x360] sm:$0xff] }
  0x37   :  { %426 = vst [vmem:[%s2519_s1 + $0x350] sm:$0xff] %v114_v42  ;;  %427 = vst [vmem:[%s2519_s1 + $0x358] sm:$0xff] %v115_v43  ;;  %v117_v45 = vld [vmem:[%s2518_s0 + $0x368] sm:$0xff]  ;;  %v118_v46 = vld [vmem:[%s2518_s0 + $0x370] sm:$0xff] }
  0x38   :  { %428 = vst [vmem:[%s2519_s1 + $0x360] sm:$0xff] %v116_v44  ;;  %429 = vst [vmem:[%s2519_s1 + $0x368] sm:$0xff] %v117_v45  ;;  %v119_v47 = vld [vmem:[%s2518_s0 + $0x378] sm:$0xff]  ;;  %v120_v48 = vld [vmem:[%s2518_s0 + $0x380] sm:$0xff] }
  0x39   :  { %430 = vst [vmem:[%s2519_s1 + $0x370] sm:$0xff] %v118_v46  ;;  %v121_v49 = vld [vmem:[%s2518_s0 + $0x388] sm:$0xff]  ;;  %431 = vst [vmem:[%s2519_s1 + $0x378] sm:$0xff] %v119_v47  ;;  %v122_v50 = vld [vmem:[%s2518_s0 + $0x390] sm:$0xff] }
  0x3a   :  { %432 = vst [vmem:[%s2519_s1 + $0x380] sm:$0xff] %v120_v48  ;;  %433 = vst [vmem:[%s2519_s1 + $0x388] sm:$0xff] %v121_v49  ;;  %v123_v51 = vld [vmem:[%s2518_s0 + $0x398] sm:$0xff]  ;;  %v124_v52 = vld [vmem:[%s2518_s0 + $0x3a0] sm:$0xff] }
  0x3b   :  { %434 = vst [vmem:[%s2519_s1 + $0x390] sm:$0xff] %v122_v50  ;;  %435 = vst [vmem:[%s2519_s1 + $0x398] sm:$0xff] %v123_v51  ;;  %v125_v53 = vld [vmem:[%s2518_s0 + $0x3a8] sm:$0xff]  ;;  %v126_v54 = vld [vmem:[%s2518_s0 + $0x3b0] sm:$0xff] }
  0x3c   :  { %436 = vst [vmem:[%s2519_s1 + $0x3a0] sm:$0xff] %v124_v52  ;;  %v127_v55 = vld [vmem:[%s2518_s0 + $0x3b8] sm:$0xff]  ;;  %437 = vst [vmem:[%s2519_s1 + $0x3a8] sm:$0xff] %v125_v53  ;;  %v128_v56 = vld [vmem:[%s2518_s0 + $0x3c0] sm:$0xff] }
  0x3d   :  { %438 = vst [vmem:[%s2519_s1 + $0x3b0] sm:$0xff] %v126_v54  ;;  %439 = vst [vmem:[%s2519_s1 + $0x3b8] sm:$0xff] %v127_v55  ;;  %v129_v57 = vld [vmem:[%s2518_s0 + $0x3c8] sm:$0xff]  ;;  %v130_v58 = vld [vmem:[%s2518_s0 + $0x3d0] sm:$0xff] }
  0x3e   :  { %440 = vst [vmem:[%s2519_s1 + $0x3c0] sm:$0xff] %v128_v56  ;;  %441 = vst [vmem:[%s2519_s1 + $0x3c8] sm:$0xff] %v129_v57  ;;  %v131_v59 = vld [vmem:[%s2518_s0 + $0x3d8] sm:$0xff]  ;;  %v132_v60 = vld [vmem:[%s2518_s0 + $0x3e0] sm:$0xff] }
  0x3f   :  { %442 = vst [vmem:[%s2519_s1 + $0x3d0] sm:$0xff] %v130_v58  ;;  %v133_v61 = vld [vmem:[%s2518_s0 + $0x3e8] sm:$0xff]  ;;  %443 = vst [vmem:[%s2519_s1 + $0x3d8] sm:$0xff] %v131_v59  ;;  %v134_v62 = vld [vmem:[%s2518_s0 + $0x3f0] sm:$0xff] }
  0x40   :  { %444 = vst [vmem:[%s2519_s1 + $0x3e0] sm:$0xff] %v132_v60  ;;  %445 = vst [vmem:[%s2519_s1 + $0x3e8] sm:$0xff] %v133_v61  ;;  %v135_v63 = vld [vmem:[%s2518_s0 + $0x3f8] sm:$0xff]  ;;  %v136_v0 = vld [vmem:[%s2518_s0 + $0x400] sm:$0xff] }
  0x41   :  { %446 = vst [vmem:[%s2519_s1 + $0x3f0] sm:$0xff] %v134_v62  ;;  %447 = vst [vmem:[%s2519_s1 + $0x3f8] sm:$0xff] %v135_v63  ;;  %v137_v1 = vld [vmem:[%s2518_s0 + $0x408] sm:$0xff]  ;;  %v138_v2 = vld [vmem:[%s2518_s0 + $0x410] sm:$0xff] }
  0x42   :  { %448 = vst [vmem:[%s2519_s1 + $0x400] sm:$0xff] %v136_v0  ;;  %v139_v3 = vld [vmem:[%s2518_s0 + $0x418] sm:$0xff]  ;;  %449 = vst [vmem:[%s2519_s1 + $0x408] sm:$0xff] %v137_v1  ;;  %v140_v4 = vld [vmem:[%s2518_s0 + $0x420] sm:$0xff] }
  0x43   :  { %450 = vst [vmem:[%s2519_s1 + $0x410] sm:$0xff] %v138_v2  ;;  %451 = vst [vmem:[%s2519_s1 + $0x418] sm:$0xff] %v139_v3  ;;  %v141_v5 = vld [vmem:[%s2518_s0 + $0x428] sm:$0xff]  ;;  %v142_v6 = vld [vmem:[%s2518_s0 + $0x430] sm:$0xff] }
  0x44   :  { %452 = vst [vmem:[%s2519_s1 + $0x420] sm:$0xff] %v140_v4  ;;  %453 = vst [vmem:[%s2519_s1 + $0x428] sm:$0xff] %v141_v5  ;;  %v143_v7 = vld [vmem:[%s2518_s0 + $0x438] sm:$0xff]  ;;  %v144_v8 = vld [vmem:[%s2518_s0 + $0x440] sm:$0xff] }
  0x45   :  { %454 = vst [vmem:[%s2519_s1 + $0x430] sm:$0xff] %v142_v6  ;;  %v145_v9 = vld [vmem:[%s2518_s0 + $0x448] sm:$0xff]  ;;  %455 = vst [vmem:[%s2519_s1 + $0x438] sm:$0xff] %v143_v7  ;;  %v146_v10 = vld [vmem:[%s2518_s0 + $0x450] sm:$0xff] }
  0x46   :  { %456 = vst [vmem:[%s2519_s1 + $0x440] sm:$0xff] %v144_v8  ;;  %457 = vst [vmem:[%s2519_s1 + $0x448] sm:$0xff] %v145_v9  ;;  %v147_v11 = vld [vmem:[%s2518_s0 + $0x458] sm:$0xff]  ;;  %v148_v12 = vld [vmem:[%s2518_s0 + $0x460] sm:$0xff] }
  0x47   :  { %458 = vst [vmem:[%s2519_s1 + $0x450] sm:$0xff] %v146_v10  ;;  %459 = vst [vmem:[%s2519_s1 + $0x458] sm:$0xff] %v147_v11  ;;  %v149_v13 = vld [vmem:[%s2518_s0 + $0x468] sm:$0xff]  ;;  %v150_v14 = vld [vmem:[%s2518_s0 + $0x470] sm:$0xff] }
  0x48   :  { %460 = vst [vmem:[%s2519_s1 + $0x460] sm:$0xff] %v148_v12  ;;  %v151_v15 = vld [vmem:[%s2518_s0 + $0x478] sm:$0xff]  ;;  %461 = vst [vmem:[%s2519_s1 + $0x468] sm:$0xff] %v149_v13  ;;  %v152_v16 = vld [vmem:[%s2518_s0 + $0x480] sm:$0xff] }
  0x49   :  { %462 = vst [vmem:[%s2519_s1 + $0x470] sm:$0xff] %v150_v14  ;;  %463 = vst [vmem:[%s2519_s1 + $0x478] sm:$0xff] %v151_v15  ;;  %v153_v17 = vld [vmem:[%s2518_s0 + $0x488] sm:$0xff]  ;;  %v154_v18 = vld [vmem:[%s2518_s0 + $0x490] sm:$0xff] }
  0x4a   :  { %464 = vst [vmem:[%s2519_s1 + $0x480] sm:$0xff] %v152_v16  ;;  %465 = vst [vmem:[%s2519_s1 + $0x488] sm:$0xff] %v153_v17  ;;  %v155_v19 = vld [vmem:[%s2518_s0 + $0x498] sm:$0xff]  ;;  %v156_v20 = vld [vmem:[%s2518_s0 + $0x4a0] sm:$0xff] }
  0x4b   :  { %466 = vst [vmem:[%s2519_s1 + $0x490] sm:$0xff] %v154_v18  ;;  %v157_v21 = vld [vmem:[%s2518_s0 + $0x4a8] sm:$0xff]  ;;  %467 = vst [vmem:[%s2519_s1 + $0x498] sm:$0xff] %v155_v19  ;;  %v158_v22 = vld [vmem:[%s2518_s0 + $0x4b0] sm:$0xff] }
  0x4c   :  { %468 = vst [vmem:[%s2519_s1 + $0x4a0] sm:$0xff] %v156_v20  ;;  %469 = vst [vmem:[%s2519_s1 + $0x4a8] sm:$0xff] %v157_v21  ;;  %v159_v23 = vld [vmem:[%s2518_s0 + $0x4b8] sm:$0xff]  ;;  %v160_v24 = vld [vmem:[%s2518_s0 + $0x4c0] sm:$0xff] }
  0x4d   :  { %470 = vst [vmem:[%s2519_s1 + $0x4b0] sm:$0xff] %v158_v22  ;;  %471 = vst [vmem:[%s2519_s1 + $0x4b8] sm:$0xff] %v159_v23  ;;  %v161_v25 = vld [vmem:[%s2518_s0 + $0x4c8] sm:$0xff]  ;;  %v162_v26 = vld [vmem:[%s2518_s0 + $0x4d0] sm:$0xff] }
  0x4e   :  { %472 = vst [vmem:[%s2519_s1 + $0x4c0] sm:$0xff] %v160_v24  ;;  %v163_v27 = vld [vmem:[%s2518_s0 + $0x4d8] sm:$0xff]  ;;  %473 = vst [vmem:[%s2519_s1 + $0x4c8] sm:$0xff] %v161_v25  ;;  %v164_v28 = vld [vmem:[%s2518_s0 + $0x4e0] sm:$0xff] }
  0x4f   :  { %474 = vst [vmem:[%s2519_s1 + $0x4d0] sm:$0xff] %v162_v26  ;;  %475 = vst [vmem:[%s2519_s1 + $0x4d8] sm:$0xff] %v163_v27  ;;  %v165_v29 = vld [vmem:[%s2518_s0 + $0x4e8] sm:$0xff]  ;;  %v166_v30 = vld [vmem:[%s2518_s0 + $0x4f0] sm:$0xff] }
  0x50   :  { %476 = vst [vmem:[%s2519_s1 + $0x4e0] sm:$0xff] %v164_v28  ;;  %477 = vst [vmem:[%s2519_s1 + $0x4e8] sm:$0xff] %v165_v29  ;;  %v167_v31 = vld [vmem:[%s2518_s0 + $0x4f8] sm:$0xff]  ;;  %v168_v32 = vld [vmem:[%s2518_s0 + $0x500] sm:$0xff] }
  0x51   :  { %478 = vst [vmem:[%s2519_s1 + $0x4f0] sm:$0xff] %v166_v30  ;;  %v169_v33 = vld [vmem:[%s2518_s0 + $0x508] sm:$0xff]  ;;  %479 = vst [vmem:[%s2519_s1 + $0x4f8] sm:$0xff] %v167_v31  ;;  %v170_v34 = vld [vmem:[%s2518_s0 + $0x510] sm:$0xff] }
  0x52   :  { %480 = vst [vmem:[%s2519_s1 + $0x500] sm:$0xff] %v168_v32  ;;  %481 = vst [vmem:[%s2519_s1 + $0x508] sm:$0xff] %v169_v33  ;;  %v171_v35 = vld [vmem:[%s2518_s0 + $0x518] sm:$0xff]  ;;  %v172_v36 = vld [vmem:[%s2518_s0 + $0x520] sm:$0xff] }
  0x53   :  { %482 = vst [vmem:[%s2519_s1 + $0x510] sm:$0xff] %v170_v34  ;;  %483 = vst [vmem:[%s2519_s1 + $0x518] sm:$0xff] %v171_v35  ;;  %v173_v37 = vld [vmem:[%s2518_s0 + $0x528] sm:$0xff]  ;;  %v174_v38 = vld [vmem:[%s2518_s0 + $0x530] sm:$0xff] }
  0x54   :  { %484 = vst [vmem:[%s2519_s1 + $0x520] sm:$0xff] %v172_v36  ;;  %v175_v39 = vld [vmem:[%s2518_s0 + $0x538] sm:$0xff]  ;;  %485 = vst [vmem:[%s2519_s1 + $0x528] sm:$0xff] %v173_v37  ;;  %v176_v40 = vld [vmem:[%s2518_s0 + $0x540] sm:$0xff] }
  0x55   :  { %486 = vst [vmem:[%s2519_s1 + $0x530] sm:$0xff] %v174_v38  ;;  %487 = vst [vmem:[%s2519_s1 + $0x538] sm:$0xff] %v175_v39  ;;  %v177_v41 = vld [vmem:[%s2518_s0 + $0x548] sm:$0xff]  ;;  %v178_v42 = vld [vmem:[%s2518_s0 + $0x550] sm:$0xff] }
  0x56   :  { %488 = vst [vmem:[%s2519_s1 + $0x540] sm:$0xff] %v176_v40  ;;  %489 = vst [vmem:[%s2519_s1 + $0x548] sm:$0xff] %v177_v41  ;;  %v179_v43 = vld [vmem:[%s2518_s0 + $0x558] sm:$0xff]  ;;  %v180_v44 = vld [vmem:[%s2518_s0 + $0x560] sm:$0xff] }
  0x57   :  { %490 = vst [vmem:[%s2519_s1 + $0x550] sm:$0xff] %v178_v42  ;;  %v181_v45 = vld [vmem:[%s2518_s0 + $0x568] sm:$0xff]  ;;  %491 = vst [vmem:[%s2519_s1 + $0x558] sm:$0xff] %v179_v43  ;;  %v182_v46 = vld [vmem:[%s2518_s0 + $0x570] sm:$0xff] }
  0x58   :  { %492 = vst [vmem:[%s2519_s1 + $0x560] sm:$0xff] %v180_v44  ;;  %493 = vst [vmem:[%s2519_s1 + $0x568] sm:$0xff] %v181_v45  ;;  %v183_v47 = vld [vmem:[%s2518_s0 + $0x578] sm:$0xff]  ;;  %v184_v48 = vld [vmem:[%s2518_s0 + $0x580] sm:$0xff] }
  0x59   :  { %494 = vst [vmem:[%s2519_s1 + $0x570] sm:$0xff] %v182_v46  ;;  %495 = vst [vmem:[%s2519_s1 + $0x578] sm:$0xff] %v183_v47  ;;  %v185_v49 = vld [vmem:[%s2518_s0 + $0x588] sm:$0xff]  ;;  %v186_v50 = vld [vmem:[%s2518_s0 + $0x590] sm:$0xff] }
  0x5a   :  { %496 = vst [vmem:[%s2519_s1 + $0x580] sm:$0xff] %v184_v48  ;;  %v187_v51 = vld [vmem:[%s2518_s0 + $0x598] sm:$0xff]  ;;  %497 = vst [vmem:[%s2519_s1 + $0x588] sm:$0xff] %v185_v49  ;;  %v188_v52 = vld [vmem:[%s2518_s0 + $0x5a0] sm:$0xff] }
  0x5b   :  { %498 = vst [vmem:[%s2519_s1 + $0x590] sm:$0xff] %v186_v50  ;;  %499 = vst [vmem:[%s2519_s1 + $0x598] sm:$0xff] %v187_v51  ;;  %v189_v53 = vld [vmem:[%s2518_s0 + $0x5a8] sm:$0xff]  ;;  %v190_v54 = vld [vmem:[%s2518_s0 + $0x5b0] sm:$0xff] }
  0x5c   :  { %500 = vst [vmem:[%s2519_s1 + $0x5a0] sm:$0xff] %v188_v52  ;;  %501 = vst [vmem:[%s2519_s1 + $0x5a8] sm:$0xff] %v189_v53  ;;  %v191_v55 = vld [vmem:[%s2518_s0 + $0x5b8] sm:$0xff]  ;;  %v192_v56 = vld [vmem:[%s2518_s0 + $0x5c0] sm:$0xff] }
  0x5d   :  { %502 = vst [vmem:[%s2519_s1 + $0x5b0] sm:$0xff] %v190_v54  ;;  %v193_v57 = vld [vmem:[%s2518_s0 + $0x5c8] sm:$0xff]  ;;  %503 = vst [vmem:[%s2519_s1 + $0x5b8] sm:$0xff] %v191_v55  ;;  %v194_v58 = vld [vmem:[%s2518_s0 + $0x5d0] sm:$0xff] }
  0x5e   :  { %504 = vst [vmem:[%s2519_s1 + $0x5c0] sm:$0xff] %v192_v56  ;;  %505 = vst [vmem:[%s2519_s1 + $0x5c8] sm:$0xff] %v193_v57  ;;  %v195_v59 = vld [vmem:[%s2518_s0 + $0x5d8] sm:$0xff]  ;;  %v196_v60 = vld [vmem:[%s2518_s0 + $0x5e0] sm:$0xff] }
  0x5f   :  { %506 = vst [vmem:[%s2519_s1 + $0x5d0] sm:$0xff] %v194_v58  ;;  %507 = vst [vmem:[%s2519_s1 + $0x5d8] sm:$0xff] %v195_v59  ;;  %v197_v61 = vld [vmem:[%s2518_s0 + $0x5e8] sm:$0xff]  ;;  %v198_v62 = vld [vmem:[%s2518_s0 + $0x5f0] sm:$0xff] }
  0x60   :  { %508 = vst [vmem:[%s2519_s1 + $0x5e0] sm:$0xff] %v196_v60  ;;  %v199_v63 = vld [vmem:[%s2518_s0 + $0x5f8] sm:$0xff]  ;;  %509 = vst [vmem:[%s2519_s1 + $0x5e8] sm:$0xff] %v197_v61  ;;  %v200_v0 = vld [vmem:[%s2518_s0 + $0x600] sm:$0xff] }
  0x61   :  { %510 = vst [vmem:[%s2519_s1 + $0x5f0] sm:$0xff] %v198_v62  ;;  %511 = vst [vmem:[%s2519_s1 + $0x5f8] sm:$0xff] %v199_v63  ;;  %v201_v1 = vld [vmem:[%s2518_s0 + $0x608] sm:$0xff]  ;;  %v202_v2 = vld [vmem:[%s2518_s0 + $0x610] sm:$0xff] }
  0x62   :  { %512 = vst [vmem:[%s2519_s1 + $0x600] sm:$0xff] %v200_v0  ;;  %513 = vst [vmem:[%s2519_s1 + $0x608] sm:$0xff] %v201_v1  ;;  %v203_v3 = vld [vmem:[%s2518_s0 + $0x618] sm:$0xff]  ;;  %v204_v4 = vld [vmem:[%s2518_s0 + $0x620] sm:$0xff] }
  0x63   :  { %514 = vst [vmem:[%s2519_s1 + $0x610] sm:$0xff] %v202_v2  ;;  %v205_v5 = vld [vmem:[%s2518_s0 + $0x628] sm:$0xff]  ;;  %515 = vst [vmem:[%s2519_s1 + $0x618] sm:$0xff] %v203_v3  ;;  %v206_v6 = vld [vmem:[%s2518_s0 + $0x630] sm:$0xff] }
  0x64   :  { %516 = vst [vmem:[%s2519_s1 + $0x620] sm:$0xff] %v204_v4  ;;  %517 = vst [vmem:[%s2519_s1 + $0x628] sm:$0xff] %v205_v5  ;;  %v207_v7 = vld [vmem:[%s2518_s0 + $0x638] sm:$0xff]  ;;  %v208_v8 = vld [vmem:[%s2518_s0 + $0x640] sm:$0xff] }
  0x65   :  { %518 = vst [vmem:[%s2519_s1 + $0x630] sm:$0xff] %v206_v6  ;;  %519 = vst [vmem:[%s2519_s1 + $0x638] sm:$0xff] %v207_v7  ;;  %v209_v9 = vld [vmem:[%s2518_s0 + $0x648] sm:$0xff]  ;;  %v210_v10 = vld [vmem:[%s2518_s0 + $0x650] sm:$0xff] }
  0x66   :  { %520 = vst [vmem:[%s2519_s1 + $0x640] sm:$0xff] %v208_v8  ;;  %v211_v11 = vld [vmem:[%s2518_s0 + $0x658] sm:$0xff]  ;;  %521 = vst [vmem:[%s2519_s1 + $0x648] sm:$0xff] %v209_v9  ;;  %v212_v12 = vld [vmem:[%s2518_s0 + $0x660] sm:$0xff] }
  0x67   :  { %522 = vst [vmem:[%s2519_s1 + $0x650] sm:$0xff] %v210_v10  ;;  %523 = vst [vmem:[%s2519_s1 + $0x658] sm:$0xff] %v211_v11  ;;  %v213_v13 = vld [vmem:[%s2518_s0 + $0x668] sm:$0xff]  ;;  %v214_v14 = vld [vmem:[%s2518_s0 + $0x670] sm:$0xff] }
  0x68   :  { %524 = vst [vmem:[%s2519_s1 + $0x660] sm:$0xff] %v212_v12  ;;  %525 = vst [vmem:[%s2519_s1 + $0x668] sm:$0xff] %v213_v13  ;;  %v215_v15 = vld [vmem:[%s2518_s0 + $0x678] sm:$0xff]  ;;  %v216_v16 = vld [vmem:[%s2518_s0 + $0x680] sm:$0xff] }
  0x69   :  { %526 = vst [vmem:[%s2519_s1 + $0x670] sm:$0xff] %v214_v14  ;;  %v217_v17 = vld [vmem:[%s2518_s0 + $0x688] sm:$0xff]  ;;  %527 = vst [vmem:[%s2519_s1 + $0x678] sm:$0xff] %v215_v15  ;;  %v218_v18 = vld [vmem:[%s2518_s0 + $0x690] sm:$0xff] }
  0x6a   :  { %528 = vst [vmem:[%s2519_s1 + $0x680] sm:$0xff] %v216_v16  ;;  %529 = vst [vmem:[%s2519_s1 + $0x688] sm:$0xff] %v217_v17  ;;  %v219_v19 = vld [vmem:[%s2518_s0 + $0x698] sm:$0xff]  ;;  %v220_v20 = vld [vmem:[%s2518_s0 + $0x6a0] sm:$0xff] }
  0x6b   :  { %530 = vst [vmem:[%s2519_s1 + $0x690] sm:$0xff] %v218_v18  ;;  %531 = vst [vmem:[%s2519_s1 + $0x698] sm:$0xff] %v219_v19  ;;  %v221_v21 = vld [vmem:[%s2518_s0 + $0x6a8] sm:$0xff]  ;;  %v222_v22 = vld [vmem:[%s2518_s0 + $0x6b0] sm:$0xff] }
  0x6c   :  { %532 = vst [vmem:[%s2519_s1 + $0x6a0] sm:$0xff] %v220_v20  ;;  %v223_v23 = vld [vmem:[%s2518_s0 + $0x6b8] sm:$0xff]  ;;  %533 = vst [vmem:[%s2519_s1 + $0x6a8] sm:$0xff] %v221_v21  ;;  %v224_v24 = vld [vmem:[%s2518_s0 + $0x6c0] sm:$0xff] }
  0x6d   :  { %534 = vst [vmem:[%s2519_s1 + $0x6b0] sm:$0xff] %v222_v22  ;;  %535 = vst [vmem:[%s2519_s1 + $0x6b8] sm:$0xff] %v223_v23  ;;  %v225_v25 = vld [vmem:[%s2518_s0 + $0x6c8] sm:$0xff]  ;;  %v226_v26 = vld [vmem:[%s2518_s0 + $0x6d0] sm:$0xff] }
  0x6e   :  { %536 = vst [vmem:[%s2519_s1 + $0x6c0] sm:$0xff] %v224_v24  ;;  %537 = vst [vmem:[%s2519_s1 + $0x6c8] sm:$0xff] %v225_v25  ;;  %v227_v27 = vld [vmem:[%s2518_s0 + $0x6d8] sm:$0xff]  ;;  %v228_v28 = vld [vmem:[%s2518_s0 + $0x6e0] sm:$0xff] }
  0x6f   :  { %538 = vst [vmem:[%s2519_s1 + $0x6d0] sm:$0xff] %v226_v26  ;;  %v229_v29 = vld [vmem:[%s2518_s0 + $0x6e8] sm:$0xff]  ;;  %539 = vst [vmem:[%s2519_s1 + $0x6d8] sm:$0xff] %v227_v27  ;;  %v230_v30 = vld [vmem:[%s2518_s0 + $0x6f0] sm:$0xff] }
  0x70   :  { %540 = vst [vmem:[%s2519_s1 + $0x6e0] sm:$0xff] %v228_v28  ;;  %541 = vst [vmem:[%s2519_s1 + $0x6e8] sm:$0xff] %v229_v29  ;;  %v231_v31 = vld [vmem:[%s2518_s0 + $0x6f8] sm:$0xff]  ;;  %v232_v32 = vld [vmem:[%s2518_s0 + $0x700] sm:$0xff] }
  0x71   :  { %542 = vst [vmem:[%s2519_s1 + $0x6f0] sm:$0xff] %v230_v30  ;;  %543 = vst [vmem:[%s2519_s1 + $0x6f8] sm:$0xff] %v231_v31  ;;  %v233_v33 = vld [vmem:[%s2518_s0 + $0x708] sm:$0xff]  ;;  %v234_v34 = vld [vmem:[%s2518_s0 + $0x710] sm:$0xff] }
  0x72   :  { %544 = vst [vmem:[%s2519_s1 + $0x700] sm:$0xff] %v232_v32  ;;  %v235_v35 = vld [vmem:[%s2518_s0 + $0x718] sm:$0xff]  ;;  %545 = vst [vmem:[%s2519_s1 + $0x708] sm:$0xff] %v233_v33  ;;  %v236_v36 = vld [vmem:[%s2518_s0 + $0x720] sm:$0xff] }
  0x73   :  { %546 = vst [vmem:[%s2519_s1 + $0x710] sm:$0xff] %v234_v34  ;;  %547 = vst [vmem:[%s2519_s1 + $0x718] sm:$0xff] %v235_v35  ;;  %v237_v37 = vld [vmem:[%s2518_s0 + $0x728] sm:$0xff]  ;;  %v238_v38 = vld [vmem:[%s2518_s0 + $0x730] sm:$0xff] }
  0x74   :  { %548 = vst [vmem:[%s2519_s1 + $0x720] sm:$0xff] %v236_v36  ;;  %549 = vst [vmem:[%s2519_s1 + $0x728] sm:$0xff] %v237_v37  ;;  %v239_v39 = vld [vmem:[%s2518_s0 + $0x738] sm:$0xff]  ;;  %v240_v40 = vld [vmem:[%s2518_s0 + $0x740] sm:$0xff] }
  0x75   :  { %550 = vst [vmem:[%s2519_s1 + $0x730] sm:$0xff] %v238_v38  ;;  %v241_v41 = vld [vmem:[%s2518_s0 + $0x748] sm:$0xff]  ;;  %551 = vst [vmem:[%s2519_s1 + $0x738] sm:$0xff] %v239_v39  ;;  %v242_v42 = vld [vmem:[%s2518_s0 + $0x750] sm:$0xff] }
  0x76   :  { %552 = vst [vmem:[%s2519_s1 + $0x740] sm:$0xff] %v240_v40  ;;  %553 = vst [vmem:[%s2519_s1 + $0x748] sm:$0xff] %v241_v41  ;;  %v243_v43 = vld [vmem:[%s2518_s0 + $0x758] sm:$0xff]  ;;  %v244_v44 = vld [vmem:[%s2518_s0 + $0x760] sm:$0xff] }
  0x77   :  { %554 = vst [vmem:[%s2519_s1 + $0x750] sm:$0xff] %v242_v42  ;;  %555 = vst [vmem:[%s2519_s1 + $0x758] sm:$0xff] %v243_v43  ;;  %v245_v45 = vld [vmem:[%s2518_s0 + $0x768] sm:$0xff]  ;;  %v246_v46 = vld [vmem:[%s2518_s0 + $0x770] sm:$0xff] }
  0x78   :  { %556 = vst [vmem:[%s2519_s1 + $0x760] sm:$0xff] %v244_v44  ;;  %v247_v47 = vld [vmem:[%s2518_s0 + $0x778] sm:$0xff]  ;;  %557 = vst [vmem:[%s2519_s1 + $0x768] sm:$0xff] %v245_v45  ;;  %v248_v48 = vld [vmem:[%s2518_s0 + $0x780] sm:$0xff] }
  0x79   :  { %558 = vst [vmem:[%s2519_s1 + $0x770] sm:$0xff] %v246_v46  ;;  %559 = vst [vmem:[%s2519_s1 + $0x778] sm:$0xff] %v247_v47  ;;  %v249_v49 = vld [vmem:[%s2518_s0 + $0x788] sm:$0xff]  ;;  %v250_v50 = vld [vmem:[%s2518_s0 + $0x790] sm:$0xff] }
  0x7a   :  { %560 = vst [vmem:[%s2519_s1 + $0x780] sm:$0xff] %v248_v48  ;;  %561 = vst [vmem:[%s2519_s1 + $0x788] sm:$0xff] %v249_v49  ;;  %v251_v51 = vld [vmem:[%s2518_s0 + $0x798] sm:$0xff]  ;;  %v252_v52 = vld [vmem:[%s2518_s0 + $0x7a0] sm:$0xff] }
  0x7b   :  { %562 = vst [vmem:[%s2519_s1 + $0x790] sm:$0xff] %v250_v50  ;;  %v253_v53 = vld [vmem:[%s2518_s0 + $0x7a8] sm:$0xff]  ;;  %563 = vst [vmem:[%s2519_s1 + $0x798] sm:$0xff] %v251_v51  ;;  %v254_v54 = vld [vmem:[%s2518_s0 + $0x7b0] sm:$0xff] }
  0x7c   :  { %564 = vst [vmem:[%s2519_s1 + $0x7a0] sm:$0xff] %v252_v52  ;;  %565 = vst [vmem:[%s2519_s1 + $0x7a8] sm:$0xff] %v253_v53  ;;  %v255_v55 = vld [vmem:[%s2518_s0 + $0x7b8] sm:$0xff]  ;;  %v256_v56 = vld [vmem:[%s2518_s0 + $0x7c0] sm:$0xff] }
  0x7d   :  { %566 = vst [vmem:[%s2519_s1 + $0x7b0] sm:$0xff] %v254_v54  ;;  %567 = vst [vmem:[%s2519_s1 + $0x7b8] sm:$0xff] %v255_v55  ;;  %v257_v57 = vld [vmem:[%s2518_s0 + $0x7c8] sm:$0xff]  ;;  %v258_v58 = vld [vmem:[%s2518_s0 + $0x7d0] sm:$0xff] }
  0x7e   :  { %568 = vst [vmem:[%s2519_s1 + $0x7c0] sm:$0xff] %v256_v56  ;;  %v259_v59 = vld [vmem:[%s2518_s0 + $0x7d8] sm:$0xff]  ;;  %569 = vst [vmem:[%s2519_s1 + $0x7c8] sm:$0xff] %v257_v57  ;;  %v260_v60 = vld [vmem:[%s2518_s0 + $0x7e0] sm:$0xff] }
  0x7f   :  { %570 = vst [vmem:[%s2519_s1 + $0x7d0] sm:$0xff] %v258_v58  ;;  %571 = vst [vmem:[%s2519_s1 + $0x7d8] sm:$0xff] %v259_v59  ;;  %v261_v61 = vld [vmem:[%s2518_s0 + $0x7e8] sm:$0xff]  ;;  %v262_v62 = vld [vmem:[%s2518_s0 + $0x7f0] sm:$0xff] }
  0x80   :  { %572 = vst [vmem:[%s2519_s1 + $0x7e0] sm:$0xff] %v260_v60  ;;  %573 = vst [vmem:[%s2519_s1 + $0x7e8] sm:$0xff] %v261_v61  ;;  %v263_v63 = vld [vmem:[%s2518_s0 + $0x7f8] sm:$0xff]  ;;  %v264_v0 = vld [vmem:[%s2518_s0 + $0x800] sm:$0xff] }
  0x81   :  { %574 = vst [vmem:[%s2519_s1 + $0x7f0] sm:$0xff] %v262_v62  ;;  %v265_v1 = vld [vmem:[%s2518_s0 + $0x808] sm:$0xff]  ;;  %575 = vst [vmem:[%s2519_s1 + $0x7f8] sm:$0xff] %v263_v63  ;;  %v266_v2 = vld [vmem:[%s2518_s0 + $0x810] sm:$0xff] }
  0x82   :  { %576 = vst [vmem:[%s2519_s1 + $0x800] sm:$0xff] %v264_v0  ;;  %577 = vst [vmem:[%s2519_s1 + $0x808] sm:$0xff] %v265_v1  ;;  %v267_v3 = vld [vmem:[%s2518_s0 + $0x818] sm:$0xff]  ;;  %v268_v4 = vld [vmem:[%s2518_s0 + $0x820] sm:$0xff] }
  0x83   :  { %578 = vst [vmem:[%s2519_s1 + $0x810] sm:$0xff] %v266_v2  ;;  %579 = vst [vmem:[%s2519_s1 + $0x818] sm:$0xff] %v267_v3  ;;  %v269_v5 = vld [vmem:[%s2518_s0 + $0x828] sm:$0xff]  ;;  %v270_v6 = vld [vmem:[%s2518_s0 + $0x830] sm:$0xff] }
  0x84   :  { %580 = vst [vmem:[%s2519_s1 + $0x820] sm:$0xff] %v268_v4  ;;  %v271_v7 = vld [vmem:[%s2518_s0 + $0x838] sm:$0xff]  ;;  %581 = vst [vmem:[%s2519_s1 + $0x828] sm:$0xff] %v269_v5  ;;  %v272_v8 = vld [vmem:[%s2518_s0 + $0x840] sm:$0xff] }
  0x85   :  { %582 = vst [vmem:[%s2519_s1 + $0x830] sm:$0xff] %v270_v6  ;;  %583 = vst [vmem:[%s2519_s1 + $0x838] sm:$0xff] %v271_v7  ;;  %v273_v9 = vld [vmem:[%s2518_s0 + $0x848] sm:$0xff]  ;;  %v274_v10 = vld [vmem:[%s2518_s0 + $0x850] sm:$0xff] }
  0x86   :  { %584 = vst [vmem:[%s2519_s1 + $0x840] sm:$0xff] %v272_v8  ;;  %585 = vst [vmem:[%s2519_s1 + $0x848] sm:$0xff] %v273_v9  ;;  %v275_v11 = vld [vmem:[%s2518_s0 + $0x858] sm:$0xff]  ;;  %v276_v12 = vld [vmem:[%s2518_s0 + $0x860] sm:$0xff] }
  0x87   :  { %586 = vst [vmem:[%s2519_s1 + $0x850] sm:$0xff] %v274_v10  ;;  %v277_v13 = vld [vmem:[%s2518_s0 + $0x868] sm:$0xff]  ;;  %587 = vst [vmem:[%s2519_s1 + $0x858] sm:$0xff] %v275_v11  ;;  %v278_v14 = vld [vmem:[%s2518_s0 + $0x870] sm:$0xff] }
  0x88   :  { %588 = vst [vmem:[%s2519_s1 + $0x860] sm:$0xff] %v276_v12  ;;  %589 = vst [vmem:[%s2519_s1 + $0x868] sm:$0xff] %v277_v13  ;;  %v279_v15 = vld [vmem:[%s2518_s0 + $0x878] sm:$0xff]  ;;  %v280_v16 = vld [vmem:[%s2518_s0 + $0x880] sm:$0xff] }
  0x89   :  { %590 = vst [vmem:[%s2519_s1 + $0x870] sm:$0xff] %v278_v14  ;;  %591 = vst [vmem:[%s2519_s1 + $0x878] sm:$0xff] %v279_v15  ;;  %v281_v17 = vld [vmem:[%s2518_s0 + $0x888] sm:$0xff]  ;;  %v282_v18 = vld [vmem:[%s2518_s0 + $0x890] sm:$0xff] }
  0x8a   :  { %592 = vst [vmem:[%s2519_s1 + $0x880] sm:$0xff] %v280_v16  ;;  %v283_v19 = vld [vmem:[%s2518_s0 + $0x898] sm:$0xff]  ;;  %593 = vst [vmem:[%s2519_s1 + $0x888] sm:$0xff] %v281_v17  ;;  %v284_v20 = vld [vmem:[%s2518_s0 + $0x8a0] sm:$0xff] }
  0x8b   :  { %594 = vst [vmem:[%s2519_s1 + $0x890] sm:$0xff] %v282_v18  ;;  %595 = vst [vmem:[%s2519_s1 + $0x898] sm:$0xff] %v283_v19  ;;  %v285_v21 = vld [vmem:[%s2518_s0 + $0x8a8] sm:$0xff]  ;;  %v286_v22 = vld [vmem:[%s2518_s0 + $0x8b0] sm:$0xff] }
  0x8c   :  { %596 = vst [vmem:[%s2519_s1 + $0x8a0] sm:$0xff] %v284_v20  ;;  %597 = vst [vmem:[%s2519_s1 + $0x8a8] sm:$0xff] %v285_v21  ;;  %v287_v23 = vld [vmem:[%s2518_s0 + $0x8b8] sm:$0xff]  ;;  %v288_v24 = vld [vmem:[%s2518_s0 + $0x8c0] sm:$0xff] }
  0x8d   :  { %598 = vst [vmem:[%s2519_s1 + $0x8b0] sm:$0xff] %v286_v22  ;;  %v289_v25 = vld [vmem:[%s2518_s0 + $0x8c8] sm:$0xff]  ;;  %599 = vst [vmem:[%s2519_s1 + $0x8b8] sm:$0xff] %v287_v23  ;;  %v290_v26 = vld [vmem:[%s2518_s0 + $0x8d0] sm:$0xff] }
  0x8e   :  { %600 = vst [vmem:[%s2519_s1 + $0x8c0] sm:$0xff] %v288_v24  ;;  %601 = vst [vmem:[%s2519_s1 + $0x8c8] sm:$0xff] %v289_v25  ;;  %v291_v27 = vld [vmem:[%s2518_s0 + $0x8d8] sm:$0xff]  ;;  %v292_v28 = vld [vmem:[%s2518_s0 + $0x8e0] sm:$0xff] }
  0x8f   :  { %602 = vst [vmem:[%s2519_s1 + $0x8d0] sm:$0xff] %v290_v26  ;;  %603 = vst [vmem:[%s2519_s1 + $0x8d8] sm:$0xff] %v291_v27  ;;  %v293_v29 = vld [vmem:[%s2518_s0 + $0x8e8] sm:$0xff]  ;;  %v294_v30 = vld [vmem:[%s2518_s0 + $0x8f0] sm:$0xff] }
  0x90   :  { %604 = vst [vmem:[%s2519_s1 + $0x8e0] sm:$0xff] %v292_v28  ;;  %v295_v31 = vld [vmem:[%s2518_s0 + $0x8f8] sm:$0xff]  ;;  %605 = vst [vmem:[%s2519_s1 + $0x8e8] sm:$0xff] %v293_v29  ;;  %v296_v32 = vld [vmem:[%s2518_s0 + $0x900] sm:$0xff] }
  0x91   :  { %606 = vst [vmem:[%s2519_s1 + $0x8f0] sm:$0xff] %v294_v30  ;;  %607 = vst [vmem:[%s2519_s1 + $0x8f8] sm:$0xff] %v295_v31  ;;  %v297_v33 = vld [vmem:[%s2518_s0 + $0x908] sm:$0xff]  ;;  %v298_v34 = vld [vmem:[%s2518_s0 + $0x910] sm:$0xff] }
  0x92   :  { %608 = vst [vmem:[%s2519_s1 + $0x900] sm:$0xff] %v296_v32  ;;  %609 = vst [vmem:[%s2519_s1 + $0x908] sm:$0xff] %v297_v33  ;;  %v299_v35 = vld [vmem:[%s2518_s0 + $0x918] sm:$0xff]  ;;  %v300_v36 = vld [vmem:[%s2518_s0 + $0x920] sm:$0xff] }
  0x93   :  { %610 = vst [vmem:[%s2519_s1 + $0x910] sm:$0xff] %v298_v34  ;;  %v301_v37 = vld [vmem:[%s2518_s0 + $0x928] sm:$0xff]  ;;  %611 = vst [vmem:[%s2519_s1 + $0x918] sm:$0xff] %v299_v35  ;;  %v302_v38 = vld [vmem:[%s2518_s0 + $0x930] sm:$0xff] }
  0x94   :  { %612 = vst [vmem:[%s2519_s1 + $0x920] sm:$0xff] %v300_v36  ;;  %613 = vst [vmem:[%s2519_s1 + $0x928] sm:$0xff] %v301_v37  ;;  %v303_v39 = vld [vmem:[%s2518_s0 + $0x938] sm:$0xff]  ;;  %v304_v40 = vld [vmem:[%s2518_s0 + $0x940] sm:$0xff] }
  0x95   :  { %614 = vst [vmem:[%s2519_s1 + $0x930] sm:$0xff] %v302_v38  ;;  %615 = vst [vmem:[%s2519_s1 + $0x938] sm:$0xff] %v303_v39  ;;  %v305_v41 = vld [vmem:[%s2518_s0 + $0x948] sm:$0xff]  ;;  %v306_v42 = vld [vmem:[%s2518_s0 + $0x950] sm:$0xff] }
  0x96   :  { %616 = vst [vmem:[%s2519_s1 + $0x940] sm:$0xff] %v304_v40  ;;  %v307_v43 = vld [vmem:[%s2518_s0 + $0x958] sm:$0xff]  ;;  %617 = vst [vmem:[%s2519_s1 + $0x948] sm:$0xff] %v305_v41  ;;  %v308_v44 = vld [vmem:[%s2518_s0 + $0x960] sm:$0xff] }
  0x97   :  { %618 = vst [vmem:[%s2519_s1 + $0x950] sm:$0xff] %v306_v42  ;;  %619 = vst [vmem:[%s2519_s1 + $0x958] sm:$0xff] %v307_v43  ;;  %v309_v45 = vld [vmem:[%s2518_s0 + $0x968] sm:$0xff]  ;;  %v310_v46 = vld [vmem:[%s2518_s0 + $0x970] sm:$0xff] }
  0x98   :  { %620 = vst [vmem:[%s2519_s1 + $0x960] sm:$0xff] %v308_v44  ;;  %621 = vst [vmem:[%s2519_s1 + $0x968] sm:$0xff] %v309_v45  ;;  %v311_v47 = vld [vmem:[%s2518_s0 + $0x978] sm:$0xff]  ;;  %v312_v48 = vld [vmem:[%s2518_s0 + $0x980] sm:$0x3] }
  0x99   :  { %622 = vst [vmem:[%s2519_s1 + $0x970] sm:$0xff] %v310_v46  ;;  %v313_v49 = vld [vmem:[%s2518_s0 + $0x988] sm:$0x3]  ;;  %623 = vst [vmem:[%s2519_s1 + $0x978] sm:$0xff] %v311_v47  ;;  %v314_v50 = vld [vmem:[%s2518_s0 + $0x990] sm:$0x3] }
  0x9a   :  { %624 = vst [vmem:[%s2519_s1 + $0x980] sm:$0x3] %v312_v48  ;;  %625 = vst [vmem:[%s2519_s1 + $0x988] sm:$0x3] %v313_v49  ;;  %v315_v51 = vld [vmem:[%s2518_s0 + $0x998] sm:$0x3] }
  0x9b   :  { %v316_v52 = vld [vmem:[%s2518_s0 + $0x9a0] sm:$0x3]  ;;  %626 = vst [vmem:[%s2519_s1 + $0x990] sm:$0x3] %v314_v50  ;;  %627 = vst [vmem:[%s2519_s1 + $0x998] sm:$0x3] %v315_v51 }
  0x9c   :  { %628 = vst [vmem:[%s2519_s1 + $0x9a0] sm:$0x3] %v316_v52  ;;  %v317_v53 = vld [vmem:[%s2518_s0 + $0x9a8] sm:$0x3]  ;;  %v318_v54 = vld [vmem:[%s2518_s0 + $0x9b0] sm:$0x3] }
  0x9d   :  { %v319_v55 = vld [vmem:[%s2518_s0 + $0x9b8] sm:$0x3]  ;;  %629 = vst [vmem:[%s2519_s1 + $0x9a8] sm:$0x3] %v317_v53  ;;  %630 = vst [vmem:[%s2519_s1 + $0x9b0] sm:$0x3] %v318_v54 }
  0x9e   :  { %631 = vst [vmem:[%s2519_s1 + $0x9b8] sm:$0x3] %v319_v55 }

</bundles_post_ra>
